<compile_context>
chip_gen: v7x
topology: tpu7x:2x2x1
jax: 0.10.0
libtpu: 0.0.40
codegen_flags: <defaults>
</compile_context>

<pallas_src>
import functools

import jax
import jax.numpy as jnp
from jax import lax
from jax.experimental import pallas as pl
from jax.experimental.pallas import tpu as pltpu


# --------------------------------------------------------------------------- #
# helpers
# --------------------------------------------------------------------------- #
def _round_up(n, m):
    return ((n + m - 1) // m) * m


def _pick_tile(n, preferred):
    # second-to-last block dim must be a multiple of 8 (16 keeps bf16 happy too)
    if n >= preferred:
        return preferred
    return _round_up(n, 16)


def _pad_axis(arr, axis, target):
    pad = target - arr.shape[axis]
    if pad == 0:
        return arr
    widths = [(0, 0)] * arr.ndim
    widths[axis] = (0, pad)
    return jnp.pad(arr, widths)


def _vmem_bytes(shape, dtype):
    """VMEM footprint of one buffer with (8, 128) tile padding."""
    itemsize = jnp.dtype(dtype).itemsize
    shape = tuple(int(s) for s in shape)
    if len(shape) == 1:
        return _round_up(shape[0], 128) * itemsize
    lead = 1
    for s in shape[:-2]:
        lead *= s
    return lead * _round_up(shape[-2], 8) * _round_up(shape[-1], 128) * itemsize


def _vmem_limit(block_items, scratch_items):
    """Footprint-derived VMEM budget (blocks are double-buffered by Pallas)."""
    total = 0
    for shape, dtype in block_items:
        total += 2 * _vmem_bytes(shape, dtype)
    for shape, dtype in scratch_items:
        total += _vmem_bytes(shape, dtype)
    try:
        cap = int(pltpu.get_tpu_info().vmem_capacity_bytes)  # 128 MiB v5e/v6e, 64 MiB v7x
    except Exception:
        cap = 64 * 1024 * 1024
    limit = max(total * 3 // 2 + (4 << 20), 32 << 20)
    return int(min(limit, cap * 3 // 4))


def _head_store_group(heads, dim_head):
    """How many heads to pack per 128-lane-aligned store in the epilogue."""
    if dim_head % 128 == 0:
        return 1
    if 128 % dim_head == 0 and heads % (128 // dim_head) == 0:
        return 128 // dim_head
    return 1


# --------------------------------------------------------------------------- #
# kernel 1: KV projection (context @ Wkv), head-major output layout
# --------------------------------------------------------------------------- #
def make_kv_proj_kernel(heads):
    def kernel(ctx_ref, wk_ref, wv_ref, k_ref, v_ref):
        ctx = ctx_ref[0]                                   # (TM, DIM_CTX), compute dtype
        for h in range(heads):
            k_ref[h] = jnp.dot(ctx, wk_ref[h],
                               preferred_element_type=jnp.float32).astype(k_ref.dtype)
            v_ref[h] = jnp.dot(ctx, wv_ref[h],
                               preferred_element_type=jnp.float32).astype(v_ref.dtype)
    return kernel


# --------------------------------------------------------------------------- #
# kernel 2: LayerNorm + Q projection + flash attention + output projection
# --------------------------------------------------------------------------- #
def make_attention_kernel(*, heads, dim_head, kv_len, tile_m, eps,
                          compute_dtype, approx_recip, out_group):
    dn = (((1,), (1,)), ((), ()))          # contract last dims, no batch dims
    needs_kv_mask = (kv_len % tile_m) != 0

    def kernel(x_ref, k_ref, v_ref, gamma_ref, beta_ref, wq_ref, wout_ref,
               nk_ref, nv_ref, o_ref, q_scr, m_scr, l_scr, acc_scr, o_slab):
        j = pl.program_id(2)
        nj = pl.num_programs(2)
        cdt = compute_dtype

        # -------- first kv tile: LN + per-head Q + null-KV seeded softmax state
        @pl.when(j == 0)
        def _init():
            x = x_ref[0].astype(jnp.float32)                        # (TN, DIM)
            mean = jnp.mean(x, axis=-1, keepdims=True)
            var = jnp.mean(jnp.square(x - mean), axis=-1, keepdims=True)
            xn = (x - mean) * lax.rsqrt(var + eps)
            xn = xn * gamma_ref[...].astype(jnp.float32) + beta_ref[...].astype(jnp.float32)
            xn_c = xn.astype(cdt)
            for h in range(heads):
                # softmax scale already folded into Wq (wrapper side); per-head
                # weights -> lane-aligned (TN, D) result, no lane slicing.
                qh = jnp.dot(xn_c, wq_ref[h],
                             preferred_element_type=jnp.float32).astype(cdt)
                q_scr[h] = qh
                sim0 = lax.dot_general(qh, nk_ref[h], dn,
                                       preferred_element_type=jnp.float32)  # (TN, NNK)
                m0 = jnp.max(sim0, axis=-1, keepdims=True)
                p0 = jnp.exp(sim0 - m0)
                m_scr[h] = m0
                l_scr[h] = jnp.sum(p0, axis=-1, keepdims=True)
                acc_scr[h] = jnp.dot(p0.astype(cdt), nv_ref[h],
                                     preferred_element_type=jnp.float32)    # (TN, D)

        # -------- every kv tile: flash-style online softmax update ------------
        def _update(masked):
            if masked:
                col = j * tile_m + lax.broadcasted_iota(jnp.int32, (1, tile_m), 1)
                kv_valid = col < kv_len                              # (1, TM)
            for h in range(heads):
                qh = q_scr[h]                                        # (TN, D)
                sim = lax.dot_general(qh, k_ref[h], dn,
                                      preferred_element_type=jnp.float32)   # (TN, TM)
                if masked:
                    sim = jnp.where(kv_valid, sim, -1e30)
                m_prev = m_scr[h]
                m_new = jnp.maximum(m_prev, jnp.max(sim, axis=-1, keepdims=True))
                alpha = jnp.exp(m_prev - m_new)
                p = jnp.exp(sim - m_new)
                l_scr[h] = alpha * l_scr[h] + jnp.sum(p, axis=-1, keepdims=True)
                acc_scr[h] = alpha * acc_scr[h] + jnp.dot(
                    p.astype(cdt), v_ref[h], preferred_element_type=jnp.float32)
                m_scr[h] = m_new

        if needs_kv_mask:
            # padded keys only exist in the final kv tile; skip the select elsewhere
            @pl.when(j < nj - 1)
            def _no_mask():
                _update(False)

            @pl.when(j == nj - 1)
            def _with_mask():
                _update(True)
        else:
            _update(False)

        # -------- last kv tile: normalize, merge heads, Wout -------------------
        @pl.when(j == nj - 1)
        def _finalize():
            d = dim_head
            for g in range(heads // out_group):
                parts = []
                for h in range(g * out_group, (g + 1) * out_group):
                    inv_l = pl.reciprocal(l_scr[h], approx=approx_recip)
                    parts.append((acc_scr[h] * inv_l).astype(cdt))
                blk = parts[0] if out_group == 1 else jnp.concatenate(parts, axis=-1)
                # 128-lane aligned store (out_group heads per store when D == 64)
                o_slab[:, g * out_group * d:(g + 1) * out_group * d] = blk
            out = jnp.dot(o_slab[...], wout_ref[...],
                          preferred_element_type=jnp.float32)        # one K=INNER matmul
            o_ref[0] = out.astype(o_ref.dtype)

    return kernel


# --------------------------------------------------------------------------- #
# wrapper
# --------------------------------------------------------------------------- #
def attention_pallas(x, context, params, *, heads, dim_head, num_null_kv,
                     tile_n=512, tile_m=256, eps=1e-5,
                     compute_dtype=jnp.bfloat16):
    if context is None:
        context = x                       # module default: kv_input = un-normalized x
    B, N, DIM = x.shape
    _, M, DIM_CTX = context.shape
    INNER = heads * dim_head
    scale = dim_head ** (-0.5)
    out_dtype = x.dtype
    cdt = jnp.dtype(compute_dtype)
    approx_recip = (jnp.dtype(out_dtype) != jnp.dtype(jnp.float32))
    out_group = _head_store_group(heads, dim_head)

    # ---- parameter glue (plain JAX, tiny): fold scale into Wq, per-head layouts
    wq = (params["wq"].astype(jnp.float32) * scale).astype(cdt)            # (DIM, INNER)
    wq_h = wq.reshape(DIM, heads, dim_head).transpose(1, 0, 2)             # (H, DIM, D)
    wkv = params["wkv"].astype(cdt)                                        # (DIM_CTX, 2*INNER)
    wk_h = wkv[:, :INNER].reshape(DIM_CTX, heads, dim_head).transpose(1, 0, 2)
    wv_h = wkv[:, INNER:].reshape(DIM_CTX, heads, dim_head).transpose(1, 0, 2)
    wout = params["wout"].astype(cdt)                                      # (INNER, DIM)
    null_kv = params["null_kv"].astype(cdt)
    nk = null_kv[:, 0::2, :]              # (H, NNK, D) null keys
    nv = null_kv[:, 1::2, :]              # (H, NNK, D) null values
    gamma = params["gamma"].reshape(1, DIM).astype(jnp.float32)
    beta = params["beta"].reshape(1, DIM).astype(jnp.float32)

    xk = x.astype(cdt)
    ctx = context.astype(cdt)

    # ---- tiling / padding ----------------------------------------------------
    tn = _pick_tile(N, tile_n)
    tm = _pick_tile(M, tile_m)
    n_pad = _round_up(N, tn)
    m_pad = _round_up(M, tm)
    xp = _pad_axis(xk, 1, n_pad)
    cp = _pad_axis(ctx, 1, m_pad)
    ni, nj = n_pad // tn, m_pad // tm

    # ---- 1) KV projection: context @ Wkv, once, head-major (B, H, M_pad, D) ---
    proj_blocks = [((1, tm, DIM_CTX), cdt),
                   ((heads, DIM_CTX, dim_head), cdt),
                   ((heads, DIM_CTX, dim_head), cdt),
                   ((heads, tm, dim_head), cdt),
                   ((heads, tm, dim_head), cdt)]
    k_all, v_all = pl.pallas_call(
        make_kv_proj_kernel(heads),
        out_shape=(jax.ShapeDtypeStruct((B, heads, m_pad, dim_head), cdt),
                   jax.ShapeDtypeStruct((B, heads, m_pad, dim_head), cdt)),
        grid_spec=pltpu.PrefetchScalarGridSpec(
            num_scalar_prefetch=0,
            grid=(B, nj),
            in_specs=[
                pl.BlockSpec((1, tm, DIM_CTX), lambda b, j: (b, j, 0)),            # context
                pl.BlockSpec((heads, DIM_CTX, dim_head), lambda b, j: (0, 0, 0)),  # Wk (per head)
                pl.BlockSpec((heads, DIM_CTX, dim_head), lambda b, j: (0, 0, 0)),  # Wv (per head)
            ],
            out_specs=[
                pl.BlockSpec((None, heads, tm, dim_head), lambda b, j: (b, 0, j, 0)),
                pl.BlockSpec((None, heads, tm, dim_head), lambda b, j: (b, 0, j, 0)),
            ],
        ),
        compiler_params=pltpu.CompilerParams(
            dimension_semantics=("parallel", "parallel"),
            vmem_limit_bytes=_vmem_limit(proj_blocks, []),
        ),
    )(cp, wk_h, wv_h)

    # ---- 2) LN + Q + flash attention + output projection ----------------------
    att_blocks = [((1, tn, DIM), cdt),
                  ((heads, tm, dim_head), cdt),
                  ((heads, tm, dim_head), cdt),
                  ((1, DIM), jnp.float32),
                  ((1, DIM), jnp.float32),
                  ((heads, DIM, dim_head), cdt),
                  ((INNER, DIM), cdt),
                  ((heads, num_null_kv, dim_head), cdt),
                  ((heads, num_null_kv, dim_head), cdt),
                  ((1, tn, DIM), out_dtype)]
    att_scratch = [((heads, tn, dim_head), cdt),
                   ((heads, tn, 1), jnp.float32),
                   ((heads, tn, 1), jnp.float32),
                   ((heads, tn, dim_head), jnp.float32),
                   ((tn, INNER), cdt)]

    kernel = make_attention_kernel(
        heads=heads, dim_head=dim_head, kv_len=M, tile_m=tm, eps=eps,
        compute_dtype=cdt, approx_recip=approx_recip, out_group=out_group)

    out = pl.pallas_call(
        kernel,
        out_shape=jax.ShapeDtypeStruct((B, n_pad, DIM), out_dtype),
        grid_spec=pltpu.PrefetchScalarGridSpec(
            num_scalar_prefetch=0,
            grid=(B, ni, nj),
            in_specs=[
                pl.BlockSpec((1, tn, DIM), lambda b, i, j: (b, i, 0)),                   # x
                pl.BlockSpec((None, heads, tm, dim_head), lambda b, i, j: (b, 0, j, 0)),  # K
                pl.BlockSpec((None, heads, tm, dim_head), lambda b, i, j: (b, 0, j, 0)),  # V
                pl.BlockSpec((1, DIM), lambda b, i, j: (0, 0)),                          # ln gamma
                pl.BlockSpec((1, DIM), lambda b, i, j: (0, 0)),                          # ln beta
                pl.BlockSpec((heads, DIM, dim_head), lambda b, i, j: (0, 0, 0)),         # Wq (pre-scaled)
                pl.BlockSpec((INNER, DIM), lambda b, i, j: (0, 0)),                      # Wout
                pl.BlockSpec((heads, num_null_kv, dim_head), lambda b, i, j: (0, 0, 0)),  # null K
                pl.BlockSpec((heads, num_null_kv, dim_head), lambda b, i, j: (0, 0, 0)),  # null V
            ],
            out_specs=pl.BlockSpec((1, tn, DIM), lambda b, i, j: (b, i, 0)),
            scratch_shapes=[
                pltpu.VMEM((heads, tn, dim_head), cdt),          # per-head Q cache
                pltpu.VMEM((heads, tn, 1), jnp.float32),         # running max
                pltpu.VMEM((heads, tn, 1), jnp.float32),         # running denom
                pltpu.VMEM((heads, tn, dim_head), jnp.float32),  # running output acc
                pltpu.VMEM((tn, INNER), cdt),                    # merged-head slab
            ],
        ),
        compiler_params=pltpu.CompilerParams(
            dimension_semantics=("parallel", "parallel", "arbitrary"),
            vmem_limit_bytes=_vmem_limit(att_blocks, att_scratch),
        ),
    )(xp, k_all, v_all, gamma, beta, wq_h, wout, nk, nv)

    return out[:, :N, :]


# --------------------------------------------------------------------------- #
# pure-JAX reference (mirrors the PyTorch forward, mask=None, causal=False)
# --------------------------------------------------------------------------- #
def attention_reference(x, context, params, *, heads, dim_head, eps=1e-5):
    B, N, DIM = x.shape
    M = context.shape[1]
    scale = dim_head ** (-0.5)

    mean = x.mean(-1, keepdims=True)
    var = ((x - mean) ** 2).mean(-1, keepdims=True)
    xn = (x - mean) / jnp.sqrt(var + eps) * params["gamma"] + params["beta"]

    q = xn @ params["wq"]
    kv = context @ params["wkv"]
    k, v = jnp.split(kv, 2, axis=-1)

    def to_heads(t, s):
        return t.reshape(B, s, heads, dim_head).transpose(0, 2, 1, 3)

    q = to_heads(q, N) * scale
    k = to_heads(k, M)
    v = to_heads(v, M)

    null_kv = params["null_kv"]
    nnk = null_kv.shape[1] // 2
    nk = jnp.broadcast_to(null_kv[None, :, 0::2, :], (B, heads, nnk, dim_head))
    nv = jnp.broadcast_to(null_kv[None, :, 1::2, :], (B, heads, nnk, dim_head))
    k = jnp.concatenate([nk, k], axis=2)
    v = jnp.concatenate([nv, v], axis=2)

    sim = jnp.einsum("bhid,bhjd->bhij", q, k)
    attn = jax.nn.softmax(sim, axis=-1)
    out = jnp.einsum("bhij,bhjd->bhid", attn, v)
    out = out.transpose(0, 2, 1, 3).reshape(B, N, heads * dim_head)
    return out @ params["wout"]


if __name__ == "__main__":
    # Small, module-consistent shapes; N/M chosen to exercise N-tiling, KV-tiling,
    # padding and key masking.
    B, N, DIM = 2, 200, 128
    HEADS, DIM_HEAD, NUM_NULL_KV = 2, 64, 2
    INNER = HEADS * DIM_HEAD

    key = jax.random.PRNGKey(0)
    kx, kc, kq, kkv, ko, knull = jax.random.split(key, 6)

    x = jax.random.normal(kx, (B, N, DIM), dtype=jnp.float32)
    params = {
        "gamma": jnp.ones((DIM,), jnp.float32),
        "beta": jnp.zeros((DIM,), jnp.float32),
        "wq": jax.random.normal(kq, (DIM, INNER), jnp.float32) * 0.05,
        "wkv": jax.random.normal(kkv, (DIM, 2 * INNER), jnp.float32) * 0.05,
        "wout": jax.random.normal(ko, (INNER, DIM), jnp.float32) * 0.05,
        "null_kv": jax.random.normal(knull, (HEADS, 2 * NUM_NULL_KV, DIM_HEAD), jnp.float32),
    }

    run = functools.partial(attention_pallas, heads=HEADS, dim_head=DIM_HEAD,
                            num_null_kv=NUM_NULL_KV)

    ref_self = attention_reference(x, x, params, heads=HEADS, dim_head=DIM_HEAD)

    # 1) self-attention, default tiles, bf16 MXU operands on an fp32 in/out path
    out1 = jax.block_until_ready(run(x, None, params))
    assert out1.shape == (B, N, DIM)
    assert jnp.allclose(out1, ref_self, atol=5e-2, rtol=5e-2), \
        float(jnp.max(jnp.abs(out1 - ref_self)))

    # 2) cross-attention with a shorter context (exercises kv masking)
    Mctx = 72
    ctx = jax.random.normal(kc, (B, Mctx, DIM), dtype=jnp.float32)
    ref_cross = attention_reference(x, ctx, params, heads=HEADS, dim_head=DIM_HEAD)
    out2 = jax.block_until_ready(run(x, ctx, params))
    assert jnp.allclose(out2, ref_cross, atol=5e-2, rtol=5e-2), \
        float(jnp.max(jnp.abs(out2 - ref_cross)))

    # 3) small tiles (multi query tiles + masked-last-kv-tile branch), fp32
    #    compute path: tight numerical check of the kernel structure
    out3 = jax.block_until_ready(run(x, None, params, tile_n=128, tile_m=128,
                                     compute_dtype=jnp.float32))
    assert jnp.allclose(out3, ref_self, atol=2e-3, rtol=2e-3), \
        float(jnp.max(jnp.abs(out3 - ref_self)))

    # 4) bf16 end-to-end (bf16 in/out, approx-reciprocal epilogue), loose check
    xb = x.astype(jnp.bfloat16)
    pb = jax.tree_util.tree_map(lambda t: t.astype(jnp.bfloat16), params)
    out4 = jax.block_until_ready(run(xb, None, pb, tile_n=128, tile_m=128))
    out4 = out4.astype(jnp.float32)
    assert out4.shape == (B, N, DIM)
    assert bool(jnp.all(jnp.isfinite(out4)))
    assert jnp.allclose(out4, ref_self, atol=1.5e-1, rtol=1.5e-1), \
        float(jnp.max(jnp.abs(out4 - ref_self)))

    print("KERNEL_OK")
</pallas_src>

<mosaic_0001>
module attributes {stable_mosaic.version = 11 : i64} {
  func.func @kernel(%arg0: i32, %arg1: i32, %arg2: memref<1x208x128xbf16, #tpu.memory_space<vmem>>, %arg3: memref<2x128x64xbf16, #tpu.memory_space<vmem>>, %arg4: memref<2x128x64xbf16, #tpu.memory_space<vmem>>, %arg5: memref<1x2x208x64xbf16, #tpu.memory_space<vmem>>, %arg6: memref<1x2x208x64xbf16, #tpu.memory_space<vmem>>) attributes {dimension_semantics = [#tpu.dimension_semantics<parallel>, #tpu.dimension_semantics<parallel>], iteration_bounds = array<i64: 2, 1>, scalar_prefetch = 0 : i64, scratch_operands = 0 : i64, tpu.core_type = #tpu.core_type<tc>, window_params = [{transform_indices = @transform_0, window_bounds = array<i64: 1, 208, 128>}, {pipeline_mode = #tpu.pipeline_mode<synchronous>, transform_indices = @transform_1, window_bounds = array<i64: 2, 128, 64>}, {pipeline_mode = #tpu.pipeline_mode<synchronous>, transform_indices = @transform_2, window_bounds = array<i64: 2, 128, 64>}, {transform_indices = @transform_3, window_bounds = array<i64: 1, 2, 208, 64>}, {transform_indices = @transform_4, window_bounds = array<i64: 1, 2, 208, 64>}]} {
    %c0 = arith.constant 0 : index
    %c0_0 = arith.constant 0 : index
    %c0_1 = arith.constant 0 : index
    %0 = vector.load %arg2[%c0, %c0_0, %c0_1] : memref<1x208x128xbf16, #tpu.memory_space<vmem>>, vector<1x208x128xbf16>
    %1 = vector.shape_cast %0 : vector<1x208x128xbf16> to vector<208x128xbf16>
    %c0_2 = arith.constant 0 : index
    %c0_3 = arith.constant 0 : index
    %c0_4 = arith.constant 0 : index
    %2 = vector.load %arg3[%c0_2, %c0_3, %c0_4] : memref<2x128x64xbf16, #tpu.memory_space<vmem>>, vector<1x128x64xbf16>
    %3 = vector.shape_cast %2 : vector<1x128x64xbf16> to vector<128x64xbf16>
    %cst = arith.constant dense<0.000000e+00> : vector<208x64xf32>
    %4 = tpu.matmul %1, %3, %cst {dimension_numbers = #tpu.dot_dimension_numbers<[1], [0], [0], [1], [0, 0, 1, 1], [], []>} : vector<208x128xbf16>, vector<128x64xbf16>, vector<208x64xf32> -> vector<208x64xf32>
    %5 = arith.truncf %4 : vector<208x64xf32> to vector<208x64xbf16>
    %c0_5 = arith.constant 0 : index
    %c0_6 = arith.constant 0 : index
    %c0_7 = arith.constant 0 : index
    %c0_8 = arith.constant 0 : index
    %6 = vector.load %arg5[%c0_5, %c0_6, %c0_7, %c0_8] : memref<1x2x208x64xbf16, #tpu.memory_space<vmem>>, vector<1x1x208x64xbf16>
    %7 = vector.shape_cast %6 : vector<1x1x208x64xbf16> to vector<208x64xbf16>
    %8 = vector.shape_cast %5 : vector<208x64xbf16> to vector<1x1x208x64xbf16>
    tpu.vector_store %arg5[%c0_5, %c0_6, %c0_7, %c0_8], %8 {strides = array<i32>} : memref<1x2x208x64xbf16, #tpu.memory_space<vmem>>, vector<1x1x208x64xbf16>,
    %c0_9 = arith.constant 0 : index
    %c0_10 = arith.constant 0 : index
    %c0_11 = arith.constant 0 : index
    %9 = vector.load %arg4[%c0_9, %c0_10, %c0_11] : memref<2x128x64xbf16, #tpu.memory_space<vmem>>, vector<1x128x64xbf16>
    %10 = vector.shape_cast %9 : vector<1x128x64xbf16> to vector<128x64xbf16>
    %cst_12 = arith.constant dense<0.000000e+00> : vector<208x64xf32>
    %11 = tpu.matmul %1, %10, %cst_12 {dimension_numbers = #tpu.dot_dimension_numbers<[1], [0], [0], [1], [0, 0, 1, 1], [], []>} : vector<208x128xbf16>, vector<128x64xbf16>, vector<208x64xf32> -> vector<208x64xf32>
    %12 = arith.truncf %11 : vector<208x64xf32> to vector<208x64xbf16>
    %c0_13 = arith.constant 0 : index
    %c0_14 = arith.constant 0 : index
    %c0_15 = arith.constant 0 : index
    %c0_16 = arith.constant 0 : index
    %13 = vector.load %arg6[%c0_13, %c0_14, %c0_15, %c0_16] : memref<1x2x208x64xbf16, #tpu.memory_space<vmem>>, vector<1x1x208x64xbf16>
    %14 = vector.shape_cast %13 : vector<1x1x208x64xbf16> to vector<208x64xbf16>
    %15 = vector.shape_cast %12 : vector<208x64xbf16> to vector<1x1x208x64xbf16>
    tpu.vector_store %arg6[%c0_13, %c0_14, %c0_15, %c0_16], %15 {strides = array<i32>} : memref<1x2x208x64xbf16, #tpu.memory_space<vmem>>, vector<1x1x208x64xbf16>,
    %c1 = arith.constant 1 : index
    %c0_17 = arith.constant 0 : index
    %c0_18 = arith.constant 0 : index
    %16 = vector.load %arg3[%c1, %c0_17, %c0_18] : memref<2x128x64xbf16, #tpu.memory_space<vmem>>, vector<1x128x64xbf16>
    %17 = vector.shape_cast %16 : vector<1x128x64xbf16> to vector<128x64xbf16>
    %cst_19 = arith.constant dense<0.000000e+00> : vector<208x64xf32>
    %18 = tpu.matmul %1, %17, %cst_19 {dimension_numbers = #tpu.dot_dimension_numbers<[1], [0], [0], [1], [0, 0, 1, 1], [], []>} : vector<208x128xbf16>, vector<128x64xbf16>, vector<208x64xf32> -> vector<208x64xf32>
    %19 = arith.truncf %18 : vector<208x64xf32> to vector<208x64xbf16>
    %c0_20 = arith.constant 0 : index
    %c1_21 = arith.constant 1 : index
    %c0_22 = arith.constant 0 : index
    %c0_23 = arith.constant 0 : index
    %20 = vector.load %arg5[%c0_20, %c1_21, %c0_22, %c0_23] : memref<1x2x208x64xbf16, #tpu.memory_space<vmem>>, vector<1x1x208x64xbf16>
    %21 = vector.shape_cast %20 : vector<1x1x208x64xbf16> to vector<208x64xbf16>
    %22 = vector.shape_cast %19 : vector<208x64xbf16> to vector<1x1x208x64xbf16>
    tpu.vector_store %arg5[%c0_20, %c1_21, %c0_22, %c0_23], %22 {strides = array<i32>} : memref<1x2x208x64xbf16, #tpu.memory_space<vmem>>, vector<1x1x208x64xbf16>,
    %c1_24 = arith.constant 1 : index
    %c0_25 = arith.constant 0 : index
    %c0_26 = arith.constant 0 : index
    %23 = vector.load %arg4[%c1_24, %c0_25, %c0_26] : memref<2x128x64xbf16, #tpu.memory_space<vmem>>, vector<1x128x64xbf16>
    %24 = vector.shape_cast %23 : vector<1x128x64xbf16> to vector<128x64xbf16>
    %cst_27 = arith.constant dense<0.000000e+00> : vector<208x64xf32>
    %25 = tpu.matmul %1, %24, %cst_27 {dimension_numbers = #tpu.dot_dimension_numbers<[1], [0], [0], [1], [0, 0, 1, 1], [], []>} : vector<208x128xbf16>, vector<128x64xbf16>, vector<208x64xf32> -> vector<208x64xf32>
    %26 = arith.truncf %25 : vector<208x64xf32> to vector<208x64xbf16>
    %c0_28 = arith.constant 0 : index
    %c1_29 = arith.constant 1 : index
    %c0_30 = arith.constant 0 : index
    %c0_31 = arith.constant 0 : index
    %27 = vector.load %arg6[%c0_28, %c1_29, %c0_30, %c0_31] : memref<1x2x208x64xbf16, #tpu.memory_space<vmem>>, vector<1x1x208x64xbf16>
    %28 = vector.shape_cast %27 : vector<1x1x208x64xbf16> to vector<208x64xbf16>
    %29 = vector.shape_cast %26 : vector<208x64xbf16> to vector<1x1x208x64xbf16>
    tpu.vector_store %arg6[%c0_28, %c1_29, %c0_30, %c0_31], %29 {strides = array<i32>} : memref<1x2x208x64xbf16, #tpu.memory_space<vmem>>, vector<1x1x208x64xbf16>,
    return
  }
  func.func @transform_0(%arg0: i32, %arg1: i32) -> (i32, i32, i32) {
    %c0_i32 = arith.constant 0 : i32
    %c0_i32_0 = arith.constant 0 : i32
    return %arg0, %arg1, %c0_i32 : i32, i32, i32
  }
  func.func @transform_1(%arg0: i32, %arg1: i32) -> (i32, i32, i32) {
    %c0_i32 = arith.constant 0 : i32
    %c0_i32_0 = arith.constant 0 : i32
    %c0_i32_1 = arith.constant 0 : i32
    %c0_i32_2 = arith.constant 0 : i32
    return %c0_i32, %c0_i32_0, %c0_i32_1 : i32, i32, i32
  }
  func.func @transform_2(%arg0: i32, %arg1: i32) -> (i32, i32, i32) {
    %c0_i32 = arith.constant 0 : i32
    %c0_i32_0 = arith.constant 0 : i32
    %c0_i32_1 = arith.constant 0 : i32
    %c0_i32_2 = arith.constant 0 : i32
    return %c0_i32, %c0_i32_0, %c0_i32_1 : i32, i32, i32
  }
  func.func @transform_3(%arg0: i32, %arg1: i32) -> (i32, i32, i32, i32) {
    %c0_i32 = arith.constant 0 : i32
    %c0_i32_0 = arith.constant 0 : i32
    %c0_i32_1 = arith.constant 0 : i32
    return %arg0, %c0_i32, %arg1, %c0_i32_0 : i32, i32, i32, i32
  }
  func.func @transform_4(%arg0: i32, %arg1: i32) -> (i32, i32, i32, i32) {
    %c0_i32 = arith.constant 0 : i32
    %c0_i32_0 = arith.constant 0 : i32
    %c0_i32_1 = arith.constant 0 : i32
    return %arg0, %c0_i32, %arg1, %c0_i32_0 : i32, i32, i32, i32
  }
}

</mosaic_0001>

<bundles_post_ra>
// kernel: tpu_custom_call.1
= control target key start
LH: loop header
LB: loop body
LE: loop exit
PB: predicated region body
PF: predicated region fallthrough
CT: control target
= control target key end

     0   :  { %s2659_s15 = smov 0   ;;  %s2661_s16 = smov 0   ;;  %s3192_s0 = inlined_call_operand.vmem [shape: bf16[2,208,128], index: 0, kind: input, shape index: {}]   ;;  %s3193_s1 = inlined_call_operand.vmem [shape: bf16[2,128,64], index: 1, kind: input, shape index: {}]   ;;  %s3194_s2 = inlined_call_operand.vmem [shape: bf16[2,128,64], index: 2, kind: input, shape index: {}]   ;;  %s3195_s3 = inlined_call_operand.vmem [shape: bf16[2,2,208,64], index: 3, kind: output, shape index: {0}]   ;;  %s3196_s4 = inlined_call_operand.vmem [shape: bf16[2,2,208,64], index: 4, kind: output, shape index: {1}]  }
   0x1   :  { %s2663_s17 = smov 0  }
   0x2 LB: > { %s27_s18 = sadd.s32 1, %s2626_s16  ;;  %p1836_p0 = scmp.ge.s32.totalorder %s2630_s17, 1  ;;  %s2630_s17 = sphi %s2663_s17, %s15_s17   ;;  %s2626_s16 = sphi %s2661_s16, %s3198_s16   ;;  %s2622_s15 = sphi %s2659_s15, %s3197_s15  }
   0x3   : > { %p29_p1 = scmp.ge.s32.totalorder %s27_s18, 2  ;;  %p188_p2 = scmp.lt.s32.totalorder %s2630_s17, 3 }
   0x5   : > { %s3200_s18 = smov (%p29_p1, %s27_s18), 0  ;;  %p189_p3 = pnand %p1836_p0, %p188_p2 }
   0x6   : > { %v2563_v0 = vld [vmem:[%s3193_s1] sm:$0xff] (!%p189_p3)   ;;  %v2632_v1 = vmov (!%p189_p3), 0.0   ;;  %v2565_v3 = vld [vmem:[%s3193_s1 + $0x8] sm:$0xff] (!%p189_p3)   ;;  %vm2633_vm0 = vmmov (!%p189_p3), 0   ;;  %p232_p4 = scmp.lt.s32.totalorder (!%p189_p3), %s2622_s15, 1  ;;  %v2567_v5 = vld [vmem:[%s3193_s1 + $0x10] sm:$0xff] (!%p189_p3)  }
   0x7   : > { %192 = sbr.rel (%p189_p3) target bundleno = 457 (0x1c9), region = 32  ;;  %2263 = vmatprep.subr.bf16.mxu0 (!%p189_p3), %v2632_v1  ;;  %2331 = vmatprep.subr.bf16.mxu1 (!%p189_p3), %v2632_v1  ;;  %v2564_v2 = vld [vmem:[%s3194_s2] sm:$0xff] (!%p189_p3)   ;;  %v2566_v4 = vld [vmem:[%s3194_s2 + $0x8] sm:$0xff] (!%p189_p3)   ;;  %v2568_v6 = vld [vmem:[%s3194_s2 + $0x10] sm:$0xff] (!%p189_p3)   ;;  %vm671_vm1 = vcmask (!%p189_p3), 519168  }
   0x8   : > { %2264 = vmatpush3.bf16.msra.mxu0 (!%p189_p3), %v2563_v0  ;;  %2279 = vmatprep.mubr.msk.bf16.mxu0 (!%p189_p3), %vm2633_vm0, %v2632_v1  ;;  %v2569_v7 = vld [vmem:[%s3193_s1 + $0x18] sm:$0xff] (!%p189_p3)   ;;  %v2571_v9 = vld [vmem:[%s3193_s1 + $0x20] sm:$0xff] (!%p189_p3)   ;;  %v2573_v11 = vld [vmem:[%s3193_s1 + $0x28] sm:$0xff] (!%p189_p3)  }
   0x9   : > { %2332 = vmatpush3.bf16.msra.mxu1 (!%p189_p3), %v2564_v2  ;;  %2265 = vmatprep.subr.bf16.mxu0 (!%p189_p3), %v2632_v1  ;;  %v2570_v8 = vld [vmem:[%s3194_s2 + $0x18] sm:$0xff] (!%p189_p3)   ;;  %v2572_v10 = vld [vmem:[%s3194_s2 + $0x20] sm:$0xff] (!%p189_p3)   ;;  %v2574_v12 = vld [vmem:[%s3194_s2 + $0x28] sm:$0xff] (!%p189_p3)  }
   0xa   : > { %2333 = vmatprep.subr.bf16.mxu1 (!%p189_p3), %v2632_v1  ;;  %2347 = vmatprep.mubr.msk.bf16.mxu1 (!%p189_p3), %vm2633_vm0, %v2632_v1  ;;  %v2575_v13 = vld [vmem:[%s3193_s1 + $0x30] sm:$0xff] (!%p189_p3)   ;;  %v2577_v15 = vld [vmem:[%s3193_s1 + $0x38] sm:$0xff] (!%p189_p3)   ;;  %v2580_v18 = vld [vmem:[%s3193_s1 + $0x40] sm:$0xff] (!%p189_p3)  }
   0xb   : > { %v2576_v14 = vld [vmem:[%s3194_s2 + $0x30] sm:$0xff] (!%p189_p3)   ;;  %v2578_v16 = vld [vmem:[%s3194_s2 + $0x38] sm:$0xff] (!%p189_p3)   ;;  %v2581_v19 = vld [vmem:[%s3194_s2 + $0x40] sm:$0xff] (!%p189_p3)  }
   0xc   : > { %2266 = vmatpush3.bf16.msra.mxu0 (!%p189_p3), %v2565_v3  ;;  %v2583_v20 = vld [vmem:[%s3193_s1 + $0x48] sm:$0xff] (!%p189_p3)   ;;  %v2587_v23 = vld [vmem:[%s3193_s1 + $0x50] sm:$0xff] (!%p189_p3)   ;;  %v2591_v25 = vld [vmem:[%s3193_s1 + $0x58] sm:$0xff] (!%p189_p3)  }
   0xd   : > { %2334 = vmatpush3.bf16.msra.mxu1 (!%p189_p3), %v2566_v4  ;;  %2267 = vmatprep.subr.bf16.mxu0 (!%p189_p3), %v2632_v1  ;;  %v2584_v21 = vld [vmem:[%s3194_s2 + $0x48] sm:$0xff] (!%p189_p3)   ;;  %v2588_v24 = vld [vmem:[%s3194_s2 + $0x50] sm:$0xff] (!%p189_p3)   ;;  %v2592_v26 = vld [vmem:[%s3194_s2 + $0x58] sm:$0xff] (!%p189_p3)  }
   0xe   : > { %s3202_s15 = smov (!%p232_p4, %s2622_s15), 1  ;;  %2335 = vmatprep.subr.bf16.mxu1 %v2632_v1  ;;  %v2594_v28 = vld [vmem:[%s3193_s1 + $0x60] sm:$0xff]   ;;  %v2598_v30 = vld [vmem:[%s3193_s1 + $0x68] sm:$0xff]   ;;  %v2601_v33 = vld [vmem:[%s3193_s1 + $0x70] sm:$0xff]  }
   0xf   : > { %s2535_s9 = smul.u32 104, %s3202_s15  ;;  %v2595_v29 = vld [vmem:[%s3194_s2 + $0x60] sm:$0xff]   ;;  %v2599_v31 = vld [vmem:[%s3194_s2 + $0x68] sm:$0xff]   ;;  %v2602_v34 = vld [vmem:[%s3194_s2 + $0x70] sm:$0xff]  }
  0x10   : > { %2268 = vmatpush3.bf16.msra.mxu0 %v2567_v5  ;;  %v2605_v35 = vld [vmem:[%s3193_s1 + $0x78] sm:$0xff]  }
  0x11   : > { %2336 = vmatpush3.bf16.msra.mxu1 %v2568_v6  ;;  %2269 = vmatprep.subr.bf16.mxu0 %v2632_v1  ;;  %s2730_s20 = scalar_lea.vmem %s3192_s0, %s2535_s9  ;;  %v2606_v36 = vld [vmem:[%s3194_s2 + $0x78] sm:$0xff]  }
  0x12   : > { %2337 = vmatprep.subr.bf16.mxu1 %v2632_v1  ;;  %v2758_v17 = vld [vmem:[%s2730_s20] sm:$0xff]   ;;  %v2782_v22 = vld [vmem:[%s2730_s20 + $0x8] sm:$0xff]   ;;  %v2807_v27 = vld [vmem:[%s2730_s20 + $0x10] sm:$0xff]  }
  0x13   : > { %v2832_v32 = vld [vmem:[%s2730_s20 + $0x18] sm:$0xff]   ;;  %v2857_v37 = vld [vmem:[%s2730_s20 + $0x20] sm:$0xff]   ;;  %v2590_v38 = vld [vmem:[%s2730_s20 + $0x28] sm:$0xff]  }
  0x14   : > { %2270 = vmatpush3.bf16.msra.mxu0 %v2569_v7  ;;  %v2593_v39 = vld [vmem:[%s2730_s20 + $0x30] sm:$0xff]   ;;  %v2596_v40 = vld [vmem:[%s2730_s20 + $0x38] sm:$0xff]   ;;  %v2597_v41 = vld [vmem:[%s2730_s20 + $0x40] sm:$0xff]  }
  0x15   : > { %2338 = vmatpush3.bf16.msra.mxu1 %v2570_v8  ;;  %2271 = vmatprep.subr.bf16.mxu0 %v2632_v1  ;;  %v2600_v42 = vld [vmem:[%s2730_s20 + $0x48] sm:$0xff]   ;;  %v2603_v43 = vld [vmem:[%s2730_s20 + $0x50] sm:$0xff]   ;;  %v2604_v44 = vld [vmem:[%s2730_s20 + $0x58] sm:$0xff]  }
  0x16   : > { %2339 = vmatprep.subr.bf16.mxu1 %v2632_v1  ;;  %v2607_v45 = vld [vmem:[%s2730_s20 + $0x60] sm:$0xff]   ;;  %s2536_s20 = smul.u32 208, %s3202_s15 }
  0x18   : > { %2272 = vmatpush3.bf16.msra.mxu0 %v2571_v9  ;;  %s2968_s25 = scalar_lea.vmem %s3195_s3, %s2536_s20  ;;  %s2973_s28 = scalar_lea.vmem %s3196_s4, %s2536_s20 }
  0x19   : > { %2340 = vmatpush3.bf16.msra.mxu1 %v2572_v10  ;;  %2273 = vmatprep.subr.bf16.mxu0 %v2632_v1 }
  0x1a   : > { %2341 = vmatprep.subr.bf16.mxu1 %v2632_v1 }
  0x1c   : > { %2274 = vmatpush3.bf16.msra.mxu0 %v2573_v11 }
  0x1d   : > { %2342 = vmatpush3.bf16.msra.mxu1 %v2574_v12  ;;  %2275 = vmatprep.subr.bf16.mxu0 %v2632_v1 }
  0x1e   : > { %2343 = vmatprep.subr.bf16.mxu1 %v2632_v1 }
  0x20   : > { %2276 = vmatpush3.bf16.msra.mxu0 %v2575_v13 }
  0x21   : > { %2344 = vmatpush3.bf16.msra.mxu1 %v2576_v14  ;;  %2277 = vmatprep.subr.bf16.mxu0 %v2632_v1 }
  0x22   : > { %2345 = vmatprep.subr.bf16.mxu1 %v2632_v1 }
  0x24   : > { %2278 = vmatpush3.bf16.msra.mxu0 %v2577_v15 }
  0x25   : > { %2346 = vmatpush3.bf16.msra.mxu1 %v2578_v16  ;;  %2399 = vmatprep.subr.bf16.mxu0 %v2632_v1 }
  0x26   : > { %2467 = vmatprep.subr.bf16.mxu1 %v2632_v1 }
  0x27   : > { %2280 = vmatmul.mubr.bf16.vlgmr.msra.gmra.mrb[0].mxu0 %v2758_v17 }
  0x28   : > { %2348 = vmatmul.mubr.bf16.vlgmr.msra.gmra.mrb[0].mxu1 %v2758_v17  ;;  %2400 = vmatpush3.bf16.msra.mxu0 %v2580_v18 }
  0x29   : > { %2468 = vmatpush3.bf16.msra.mxu1 %v2581_v19  ;;  %2283 = vmatprep.mubr.msk.bf16.mxu0 %vm2633_vm0, %v2632_v1 }
  0x2a   : > { %2351 = vmatprep.mubr.msk.bf16.mxu1 %vm2633_vm0, %v2632_v1  ;;  %2401 = vmatprep.subr.bf16.mxu0 %v2632_v1 }
  0x2b   : > { %2469 = vmatprep.subr.bf16.mxu1 %v2632_v1 }
  0x2c   : > { %2402 = vmatpush3.bf16.msra.mxu0 %v2583_v20 }
  0x2d   : > { %2470 = vmatpush3.bf16.msra.mxu1 %v2584_v21  ;;  %2403 = vmatprep.subr.bf16.mxu0 %v2632_v1 }
  0x2e   : > { %2471 = vmatprep.subr.bf16.mxu1 %v2632_v1 }
  0x2f   : > { %2284 = vmatmul.mubr.bf16.gmra.mrb[4].mxu0 %v2782_v22 }
  0x30   : > { %2352 = vmatmul.mubr.bf16.gmra.mrb[4].mxu1 %v2782_v22  ;;  %2287 = vmatprep.mubr.msk.bf16.mxu0 %vm2633_vm0, %v2632_v1 }
  0x31   : > { %2355 = vmatprep.mubr.msk.bf16.mxu1 %vm2633_vm0, %v2632_v1  ;;  %2404 = vmatpush3.bf16.msra.mxu0 %v2587_v23 }
  0x32   : > { %2472 = vmatpush3.bf16.msra.mxu1 %v2588_v24  ;;  %2405 = vmatprep.subr.bf16.mxu0 %v2632_v1 }
  0x33   : > { %2473 = vmatprep.subr.bf16.mxu1 %v2632_v1 }
  0x35   : > { %2406 = vmatpush3.bf16.msra.mxu0 %v2591_v25 }
  0x36   : > { %2474 = vmatpush3.bf16.msra.mxu1 %v2592_v26  ;;  %2407 = vmatprep.subr.bf16.mxu0 %v2632_v1 }
  0x37   : > { %2288 = vmatmul.mubr.bf16.gmra.mrb[8].mxu0 %v2807_v27  ;;  %2475 = vmatprep.subr.bf16.mxu1 %v2632_v1 }
  0x38   : > { %2356 = vmatmul.mubr.bf16.gmra.mrb[8].mxu1 %v2807_v27  ;;  %2291 = vmatprep.mubr.msk.bf16.mxu0 %vm2633_vm0, %v2632_v1 }
  0x39   : > { %2359 = vmatprep.mubr.msk.bf16.mxu1 %vm2633_vm0, %v2632_v1  ;;  %2408 = vmatpush3.bf16.msra.mxu0 %v2594_v28 }
  0x3a   : > { %2476 = vmatpush3.bf16.msra.mxu1 %v2595_v29  ;;  %2409 = vmatprep.subr.bf16.mxu0 %v2632_v1 }
  0x3b   : > { %2477 = vmatprep.subr.bf16.mxu1 %v2632_v1 }
  0x3d   : > { %2410 = vmatpush3.bf16.msra.mxu0 %v2598_v30 }
  0x3e   : > { %2478 = vmatpush3.bf16.msra.mxu1 %v2599_v31  ;;  %2411 = vmatprep.subr.bf16.mxu0 %v2632_v1 }
  0x3f   : > { %2292 = vmatmul.mubr.bf16.gmra.mrb[12].mxu0 %v2832_v32  ;;  %2479 = vmatprep.subr.bf16.mxu1 %v2632_v1 }
  0x40   : > { %2360 = vmatmul.mubr.bf16.gmra.mrb[12].mxu1 %v2832_v32  ;;  %2295 = vmatprep.mubr.msk.bf16.mxu0 %vm2633_vm0, %v2632_v1 }
  0x41   : > { %2363 = vmatprep.mubr.msk.bf16.mxu1 %vm2633_vm0, %v2632_v1  ;;  %2412 = vmatpush3.bf16.msra.mxu0 %v2601_v33 }
  0x42   : > { %2480 = vmatpush3.bf16.msra.mxu1 %v2602_v34  ;;  %2413 = vmatprep.subr.bf16.mxu0 %v2632_v1 }
  0x43   : > { %2481 = vmatprep.subr.bf16.mxu1 %v2632_v1 }
  0x45   : > { %2414 = vmatpush3.bf16.msra.mxu0 %v2605_v35 }
  0x46   : > { %2482 = vmatpush3.bf16.msra.mxu1 %v2606_v36 }
  0x47   : > { %2296 = vmatmul.mubr.bf16.gmra.mrb[16].mxu0 %v2857_v37 }
  0x48   : > { %2364 = vmatmul.mubr.bf16.gmra.mrb[16].mxu1 %v2857_v37  ;;  %2299 = vmatprep.mubr.msk.bf16.mxu0 %vm2633_vm0, %v2632_v1 }
  0x49   : > { %2367 = vmatprep.mubr.msk.bf16.mxu1 %vm2633_vm0, %v2632_v1 }
  0x4f   : > { %2300 = vmatmul.mubr.bf16.gmra.mrb[20].mxu0 %v2590_v38 }
  0x50   : > { %2368 = vmatmul.mubr.bf16.gmra.mrb[20].mxu1 %v2590_v38  ;;  %2303 = vmatprep.mubr.msk.bf16.mxu0 %vm2633_vm0, %v2632_v1 }
  0x51   : > { %2371 = vmatprep.mubr.msk.bf16.mxu1 %vm2633_vm0, %v2632_v1 }
  0x57   : > { %2304 = vmatmul.mubr.bf16.gmra.mrb[24].mxu0 %v2593_v39 }
  0x58   : > { %2372 = vmatmul.mubr.bf16.gmra.mrb[24].mxu1 %v2593_v39  ;;  %2307 = vmatprep.mubr.msk.bf16.mxu0 %vm2633_vm0, %v2632_v1 }
  0x59   : > { %2375 = vmatprep.mubr.msk.bf16.mxu1 %vm2633_vm0, %v2632_v1 }
  0x5f   : > { %2308 = vmatmul.mubr.bf16.gmra.mrb[28].mxu0 %v2596_v40 }
  0x60   : > { %2376 = vmatmul.mubr.bf16.gmra.mrb[28].mxu1 %v2596_v40  ;;  %2311 = vmatprep.mubr.msk.bf16.mxu0 %vm2633_vm0, %v2632_v1 }
  0x61   : > { %2379 = vmatprep.mubr.msk.bf16.mxu1 %vm2633_vm0, %v2632_v1 }
  0x67   : > { %2312 = vmatmul.mubr.bf16.gmra.mrb[32].mxu0 %v2597_v41 }
  0x68   : > { %2380 = vmatmul.mubr.bf16.gmra.mrb[32].mxu1 %v2597_v41  ;;  %2315 = vmatprep.mubr.msk.bf16.mxu0 %vm2633_vm0, %v2632_v1 }
  0x69   : > { %2383 = vmatprep.mubr.msk.bf16.mxu1 %vm2633_vm0, %v2632_v1 }
  0x6f   : > { %2316 = vmatmul.mubr.bf16.gmra.mrb[36].mxu0 %v2600_v42 }
  0x70   : > { %2384 = vmatmul.mubr.bf16.gmra.mrb[36].mxu1 %v2600_v42  ;;  %2319 = vmatprep.mubr.msk.bf16.mxu0 %vm2633_vm0, %v2632_v1 }
  0x71   : > { %2387 = vmatprep.mubr.msk.bf16.mxu1 %vm2633_vm0, %v2632_v1 }
  0x77   : > { %2320 = vmatmul.mubr.bf16.gmra.mrb[40].mxu0 %v2603_v43 }
  0x78   : > { %2388 = vmatmul.mubr.bf16.gmra.mrb[40].mxu1 %v2603_v43  ;;  %2323 = vmatprep.mubr.msk.bf16.mxu0 %vm2633_vm0, %v2632_v1 }
  0x79   : > { %2391 = vmatprep.mubr.msk.bf16.mxu1 %vm2633_vm0, %v2632_v1 }
  0x7f   : > { %2324 = vmatmul.mubr.bf16.gmra.mrb[44].mxu0 %v2604_v44 }
  0x80   : > { %2392 = vmatmul.mubr.bf16.gmra.mrb[44].mxu1 %v2604_v44  ;;  %2327 = vmatprep.mubr.msk.bf16.mxu0 %vm2633_vm0, %v2632_v1 }
  0x81   : > { %2395 = vmatprep.mubr.msk.bf16.mxu1 %vm2633_vm0, %v2632_v1 }
  0x87   : > { %2328 = vmatmul.mubr.bf16.gmra.mrb[48].mxu0 %v2607_v45 }
  0x88   : > { %2396 = vmatmul.mubr.bf16.gmra.mrb[48].mxu1 %v2607_v45  ;;  %2415 = vmatprep.mubr.msk.bf16.mxu0 %vm2633_vm0, %v2632_v1 }
  0x89   : > { %2483 = vmatprep.mubr.msk.bf16.mxu1 %vm2633_vm0, %v2632_v1 }
  0x8f   : > { %2416 = vmatmul.mubr.bf16.vlgmr.msra.gmra.mrb[52].mxu0 %v2758_v17 }
  0x90   : > { %2484 = vmatmul.mubr.bf16.vlgmr.msra.gmra.mrb[52].mxu1 %v2758_v17  ;;  %2419 = vmatprep.mubr.msk.bf16.mxu0 %vm2633_vm0, %v2632_v1 }
  0x91   : > { %2487 = vmatprep.mubr.msk.bf16.mxu1 %vm2633_vm0, %v2632_v1 }
  0x97   : > { %2420 = vmatmul.mubr.bf16.gmra.mrb[56].mxu0 %v2782_v22 }
  0x98   : > { %2488 = vmatmul.mubr.bf16.gmra.mrb[56].mxu1 %v2782_v22  ;;  %2423 = vmatprep.mubr.msk.bf16.mxu0 %vm2633_vm0, %v2632_v1 }
  0x99   : > { %2491 = vmatprep.mubr.msk.bf16.mxu1 %vm2633_vm0, %v2632_v1 }
  0x9f   : > { %2424 = vmatmul.mubr.bf16.gmra.mrb[60].mxu0 %v2807_v27 }
  0xa0   : > { %2492 = vmatmul.mubr.bf16.gmra.mrb[60].mxu1 %v2807_v27  ;;  %2427 = vmatprep.mubr.msk.bf16.mxu0 %vm2633_vm0, %v2632_v1 }
  0xa1   : > { %2495 = vmatprep.mubr.msk.bf16.mxu1 %vm2633_vm0, %v2632_v1 }
  0xa7   : > { %2428 = vmatmul.mubr.bf16.gmra.mrb[64].mxu0 %v2832_v32 }
  0xa8   : > { %2496 = vmatmul.mubr.bf16.gmra.mrb[64].mxu1 %v2832_v32  ;;  %2431 = vmatprep.mubr.msk.bf16.mxu0 %vm2633_vm0, %v2632_v1 }
  0xa9   : > { %2499 = vmatprep.mubr.msk.bf16.mxu1 %vm2633_vm0, %v2632_v1 }
  0xaf   : > { %2432 = vmatmul.mubr.bf16.gmra.mrb[68].mxu0 %v2857_v37 }
  0xb0   : > { %2500 = vmatmul.mubr.bf16.gmra.mrb[68].mxu1 %v2857_v37  ;;  %2435 = vmatprep.mubr.msk.bf16.mxu0 %vm2633_vm0, %v2632_v1 }
  0xb1   : > { %2503 = vmatprep.mubr.msk.bf16.mxu1 %vm2633_vm0, %v2632_v1 }
  0xb7   : > { %2436 = vmatmul.mubr.bf16.gmra.mrb[72].mxu0 %v2590_v38 }
  0xb8   : > { %2504 = vmatmul.mubr.bf16.gmra.mrb[72].mxu1 %v2590_v38  ;;  %2439 = vmatprep.mubr.msk.bf16.mxu0 %vm2633_vm0, %v2632_v1 }
  0xb9   : > { %2507 = vmatprep.mubr.msk.bf16.mxu1 %vm2633_vm0, %v2632_v1 }
  0xbf   : > { %2440 = vmatmul.mubr.bf16.gmra.mrb[76].mxu0 %v2593_v39 }
  0xc0   : > { %2508 = vmatmul.mubr.bf16.gmra.mrb[76].mxu1 %v2593_v39  ;;  %2443 = vmatprep.mubr.msk.bf16.mxu0 %vm2633_vm0, %v2632_v1 }
  0xc1   : > { %2511 = vmatprep.mubr.msk.bf16.mxu1 %vm2633_vm0, %v2632_v1 }
  0xc7   : > { %2444 = vmatmul.mubr.bf16.gmra.mrb[80].mxu0 %v2596_v40 }
  0xc8   : > { %2512 = vmatmul.mubr.bf16.gmra.mrb[80].mxu1 %v2596_v40  ;;  %2447 = vmatprep.mubr.msk.bf16.mxu0 %vm2633_vm0, %v2632_v1 }
  0xc9   : > { %2515 = vmatprep.mubr.msk.bf16.mxu1 %vm2633_vm0, %v2632_v1 }
  0xcf   : > { %2448 = vmatmul.mubr.bf16.gmra.mrb[84].mxu0 %v2597_v41 }
  0xd0   : > { %2516 = vmatmul.mubr.bf16.gmra.mrb[84].mxu1 %v2597_v41  ;;  %2451 = vmatprep.mubr.msk.bf16.mxu0 %vm2633_vm0, %v2632_v1 }
  0xd1   : > { %2519 = vmatprep.mubr.msk.bf16.mxu1 %vm2633_vm0, %v2632_v1 }
  0xd7   : > { %2452 = vmatmul.mubr.bf16.gmra.mrb[88].mxu0 %v2600_v42 }
  0xd8   : > { %2520 = vmatmul.mubr.bf16.gmra.mrb[88].mxu1 %v2600_v42  ;;  %2455 = vmatprep.mubr.msk.bf16.mxu0 %vm2633_vm0, %v2632_v1 }
  0xd9   : > { %2523 = vmatprep.mubr.msk.bf16.mxu1 %vm2633_vm0, %v2632_v1 }
  0xdf   : > { %2456 = vmatmul.mubr.bf16.gmra.mrb[92].mxu0 %v2603_v43 }
  0xe0   : > { %2524 = vmatmul.mubr.bf16.gmra.mrb[92].mxu1 %v2603_v43  ;;  %2459 = vmatprep.mubr.msk.bf16.mxu0 %vm2633_vm0, %v2632_v1 }
  0xe1   : > { %2527 = vmatprep.mubr.msk.bf16.mxu1 %vm2633_vm0, %v2632_v1 }
  0xe7   : > { %2460 = vmatmul.mubr.bf16.gmra.mrb[96].mxu0 %v2604_v44 }
  0xe8   : > { %2528 = vmatmul.mubr.bf16.gmra.mrb[96].mxu1 %v2604_v44  ;;  %2463 = vmatprep.mubr.msk.bf16.mxu0 %vm2633_vm0, %v2632_v1 }
  0xe9   : > { %2531 = vmatprep.mubr.msk.bf16.mxu1 %vm2633_vm0, %v2632_v1 }
  0xef   : > { %2464 = vmatmul.mubr.bf16.gmra.mrb[100].mxu0 %v2607_v45 }
  0xf0   : > { %2532 = vmatmul.mubr.bf16.gmra.mrb[100].mxu1 %v2607_v45 }
  0xfa   : > { %v464_v46 = vpop.f32.mrb[0].mxu0 }
  0xfb   : > { %v2075_v47 = vpack.c.bf16 %v464_v46, %v464_v46  ;;  %v796_v48 = vpop.f32.mrb[0].mxu1  ;;  %v2281_v49 = vpop.f32.mrb[1].mxu0 }
  0xfc   : > { %v2101_v50 = vpack.c.bf16 %v796_v48, %v796_v48  ;;  %v2349_v51 = vpop.f32.mrb[1].mxu1  ;;  %v467_v52 = vpop.f32.mrb[2].mxu0 }
  0xfd   : > { %672 = vst.msk [vmem:[%s2968_s25] sm:$0xf] %vm671_vm1, %v2075_v47  ;;  %v2076_v53 = vpack.c.bf16 %v467_v52, %v467_v52  ;;  %v799_v54 = vpop.f32.mrb[2].mxu1  ;;  %v2282_v55 = vpop.f32.mrb[3].mxu0 }
  0xfe   : > { %1003 = vst.msk [vmem:[%s2973_s28] sm:$0xf] %vm671_vm1, %v2101_v50  ;;  %v2102_v56 = vpack.c.bf16 %v799_v54, %v799_v54  ;;  %v2350_v57 = vpop.f32.mrb[3].mxu1 }
  0xff   : > { %673 = vst.msk [vmem:[%s2968_s25 + $0x4] sm:$0xf] %vm671_vm1, %v2076_v53 }
 0x100   : > { %1004 = vst.msk [vmem:[%s2973_s28 + $0x4] sm:$0xf] %vm671_vm1, %v2102_v56 }
 0x102   : > { %v472_v58 = vpop.f32.mrb[4].mxu0 }
 0x103   : > { %v2077_v59 = vpack.c.bf16 %v472_v58, %v472_v58  ;;  %v804_v60 = vpop.f32.mrb[4].mxu1  ;;  %v2285_v61 = vpop.f32.mrb[5].mxu0 }
 0x104   : > { %v2103_v62 = vpack.c.bf16 %v804_v60, %v804_v60  ;;  %v2353_v63 = vpop.f32.mrb[5].mxu1  ;;  %v475_v0 = vpop.f32.mrb[6].mxu0 }
 0x105   : > { %674 = vst.msk [vmem:[%s2968_s25 + $0x8] sm:$0xf] %vm671_vm1, %v2077_v59  ;;  %v2078_v1 = vpack.c.bf16 %v475_v0, %v475_v0  ;;  %v807_v2 = vpop.f32.mrb[6].mxu1  ;;  %v2286_v3 = vpop.f32.mrb[7].mxu0 }
 0x106   : > { %1005 = vst.msk [vmem:[%s2973_s28 + $0x8] sm:$0xf] %vm671_vm1, %v2103_v62  ;;  %v2104_v4 = vpack.c.bf16 %v807_v2, %v807_v2  ;;  %v2354_v5 = vpop.f32.mrb[7].mxu1 }
 0x107   : > { %675 = vst.msk [vmem:[%s2968_s25 + $0xc] sm:$0xf] %vm671_vm1, %v2078_v1 }
 0x108   : > { %1006 = vst.msk [vmem:[%s2973_s28 + $0xc] sm:$0xf] %vm671_vm1, %v2104_v4 }
 0x10a   : > { %v480_v6 = vpop.f32.mrb[8].mxu0 }
 0x10b   : > { %v2079_v7 = vpack.c.bf16 %v480_v6, %v480_v6  ;;  %v812_v8 = vpop.f32.mrb[8].mxu1  ;;  %v2289_v9 = vpop.f32.mrb[9].mxu0 }
 0x10c   : > { %v2105_v10 = vpack.c.bf16 %v812_v8, %v812_v8  ;;  %v2357_v11 = vpop.f32.mrb[9].mxu1  ;;  %v483_v12 = vpop.f32.mrb[10].mxu0 }
 0x10d   : > { %676 = vst.msk [vmem:[%s2968_s25 + $0x10] sm:$0xf] %vm671_vm1, %v2079_v7  ;;  %v2080_v13 = vpack.c.bf16 %v483_v12, %v483_v12  ;;  %v815_v14 = vpop.f32.mrb[10].mxu1  ;;  %v2290_v15 = vpop.f32.mrb[11].mxu0 }
 0x10e   : > { %1007 = vst.msk [vmem:[%s2973_s28 + $0x10] sm:$0xf] %vm671_vm1, %v2105_v10  ;;  %v2106_v16 = vpack.c.bf16 %v815_v14, %v815_v14  ;;  %v2358_v17 = vpop.f32.mrb[11].mxu1 }
 0x10f   : > { %677 = vst.msk [vmem:[%s2968_s25 + $0x14] sm:$0xf] %vm671_vm1, %v2080_v13 }
 0x110   : > { %1008 = vst.msk [vmem:[%s2973_s28 + $0x14] sm:$0xf] %vm671_vm1, %v2106_v16 }
 0x112   : > { %v488_v18 = vpop.f32.mrb[12].mxu0 }
 0x113   : > { %v2081_v19 = vpack.c.bf16 %v488_v18, %v488_v18  ;;  %v820_v20 = vpop.f32.mrb[12].mxu1  ;;  %v2293_v21 = vpop.f32.mrb[13].mxu0 }
 0x114   : > { %v2107_v22 = vpack.c.bf16 %v820_v20, %v820_v20  ;;  %v2361_v23 = vpop.f32.mrb[13].mxu1  ;;  %v491_v24 = vpop.f32.mrb[14].mxu0 }
 0x115   : > { %678 = vst.msk [vmem:[%s2968_s25 + $0x18] sm:$0xf] %vm671_vm1, %v2081_v19  ;;  %v2082_v25 = vpack.c.bf16 %v491_v24, %v491_v24  ;;  %v823_v26 = vpop.f32.mrb[14].mxu1  ;;  %v2294_v27 = vpop.f32.mrb[15].mxu0 }
 0x116   : > { %1009 = vst.msk [vmem:[%s2973_s28 + $0x18] sm:$0xf] %vm671_vm1, %v2107_v22  ;;  %v2108_v28 = vpack.c.bf16 %v823_v26, %v823_v26  ;;  %v2362_v29 = vpop.f32.mrb[15].mxu1 }
 0x117   : > { %679 = vst.msk [vmem:[%s2968_s25 + $0x1c] sm:$0xf] %vm671_vm1, %v2082_v25 }
 0x118   : > { %1010 = vst.msk [vmem:[%s2973_s28 + $0x1c] sm:$0xf] %vm671_vm1, %v2108_v28 }
 0x11a   : > { %v496_v30 = vpop.f32.mrb[16].mxu0 }
 0x11b   : > { %v2083_v31 = vpack.c.bf16 %v496_v30, %v496_v30  ;;  %v828_v32 = vpop.f32.mrb[16].mxu1  ;;  %v2297_v33 = vpop.f32.mrb[17].mxu0 }
 0x11c   : > { %v2109_v34 = vpack.c.bf16 %v828_v32, %v828_v32  ;;  %v2365_v35 = vpop.f32.mrb[17].mxu1  ;;  %v499_v36 = vpop.f32.mrb[18].mxu0 }
 0x11d   : > { %680 = vst.msk [vmem:[%s2968_s25 + $0x20] sm:$0xf] %vm671_vm1, %v2083_v31  ;;  %v2084_v37 = vpack.c.bf16 %v499_v36, %v499_v36  ;;  %v831_v38 = vpop.f32.mrb[18].mxu1  ;;  %v2298_v39 = vpop.f32.mrb[19].mxu0 }
 0x11e   : > { %1011 = vst.msk [vmem:[%s2973_s28 + $0x20] sm:$0xf] %vm671_vm1, %v2109_v34  ;;  %v2110_v40 = vpack.c.bf16 %v831_v38, %v831_v38  ;;  %v2366_v41 = vpop.f32.mrb[19].mxu1 }
 0x11f   : > { %681 = vst.msk [vmem:[%s2968_s25 + $0x24] sm:$0xf] %vm671_vm1, %v2084_v37 }
 0x120   : > { %1012 = vst.msk [vmem:[%s2973_s28 + $0x24] sm:$0xf] %vm671_vm1, %v2110_v40 }
 0x122   : > { %v504_v42 = vpop.f32.mrb[20].mxu0 }
 0x123   : > { %v2085_v43 = vpack.c.bf16 %v504_v42, %v504_v42  ;;  %v836_v44 = vpop.f32.mrb[20].mxu1  ;;  %v2301_v45 = vpop.f32.mrb[21].mxu0 }
 0x124   : > { %v2111_v46 = vpack.c.bf16 %v836_v44, %v836_v44  ;;  %v2369_v47 = vpop.f32.mrb[21].mxu1  ;;  %v507_v48 = vpop.f32.mrb[22].mxu0 }
 0x125   : > { %682 = vst.msk [vmem:[%s2968_s25 + $0x28] sm:$0xf] %vm671_vm1, %v2085_v43  ;;  %v2086_v49 = vpack.c.bf16 %v507_v48, %v507_v48  ;;  %v839_v50 = vpop.f32.mrb[22].mxu1  ;;  %v2302_v51 = vpop.f32.mrb[23].mxu0 }
 0x126   : > { %1013 = vst.msk [vmem:[%s2973_s28 + $0x28] sm:$0xf] %vm671_vm1, %v2111_v46  ;;  %v2112_v52 = vpack.c.bf16 %v839_v50, %v839_v50  ;;  %v2370_v53 = vpop.f32.mrb[23].mxu1 }
 0x127   : > { %683 = vst.msk [vmem:[%s2968_s25 + $0x2c] sm:$0xf] %vm671_vm1, %v2086_v49 }
 0x128   : > { %1014 = vst.msk [vmem:[%s2973_s28 + $0x2c] sm:$0xf] %vm671_vm1, %v2112_v52 }
 0x12a   : > { %v512_v54 = vpop.f32.mrb[24].mxu0 }
 0x12b   : > { %v2087_v55 = vpack.c.bf16 %v512_v54, %v512_v54  ;;  %v844_v56 = vpop.f32.mrb[24].mxu1  ;;  %v2305_v57 = vpop.f32.mrb[25].mxu0 }
 0x12c   : > { %v2113_v58 = vpack.c.bf16 %v844_v56, %v844_v56  ;;  %v2373_v59 = vpop.f32.mrb[25].mxu1  ;;  %v515_v60 = vpop.f32.mrb[26].mxu0 }
 0x12d   : > { %684 = vst.msk [vmem:[%s2968_s25 + $0x30] sm:$0xf] %vm671_vm1, %v2087_v55  ;;  %v2088_v61 = vpack.c.bf16 %v515_v60, %v515_v60  ;;  %v847_v62 = vpop.f32.mrb[26].mxu1  ;;  %v2306_v63 = vpop.f32.mrb[27].mxu0 }
 0x12e   : > { %1015 = vst.msk [vmem:[%s2973_s28 + $0x30] sm:$0xf] %vm671_vm1, %v2113_v58  ;;  %v2114_v0 = vpack.c.bf16 %v847_v62, %v847_v62  ;;  %v2374_v1 = vpop.f32.mrb[27].mxu1 }
 0x12f   : > { %685 = vst.msk [vmem:[%s2968_s25 + $0x34] sm:$0xf] %vm671_vm1, %v2088_v61 }
 0x130   : > { %1016 = vst.msk [vmem:[%s2973_s28 + $0x34] sm:$0xf] %vm671_vm1, %v2114_v0 }
 0x132   : > { %v520_v2 = vpop.f32.mrb[28].mxu0 }
 0x133   : > { %v2089_v3 = vpack.c.bf16 %v520_v2, %v520_v2  ;;  %v852_v4 = vpop.f32.mrb[28].mxu1  ;;  %v2309_v5 = vpop.f32.mrb[29].mxu0 }
 0x134   : > { %v2115_v6 = vpack.c.bf16 %v852_v4, %v852_v4  ;;  %v2377_v7 = vpop.f32.mrb[29].mxu1  ;;  %v523_v8 = vpop.f32.mrb[30].mxu0 }
 0x135   : > { %686 = vst.msk [vmem:[%s2968_s25 + $0x38] sm:$0xf] %vm671_vm1, %v2089_v3  ;;  %v2090_v9 = vpack.c.bf16 %v523_v8, %v523_v8  ;;  %v855_v10 = vpop.f32.mrb[30].mxu1  ;;  %v2310_v11 = vpop.f32.mrb[31].mxu0 }
 0x136   : > { %1017 = vst.msk [vmem:[%s2973_s28 + $0x38] sm:$0xf] %vm671_vm1, %v2115_v6  ;;  %v2116_v12 = vpack.c.bf16 %v855_v10, %v855_v10  ;;  %v2378_v13 = vpop.f32.mrb[31].mxu1 }
 0x137   : > { %687 = vst.msk [vmem:[%s2968_s25 + $0x3c] sm:$0xf] %vm671_vm1, %v2090_v9 }
 0x138   : > { %1018 = vst.msk [vmem:[%s2973_s28 + $0x3c] sm:$0xf] %vm671_vm1, %v2116_v12 }
 0x13a   : > { %v528_v14 = vpop.f32.mrb[32].mxu0 }
 0x13b   : > { %v2091_v15 = vpack.c.bf16 %v528_v14, %v528_v14  ;;  %v860_v16 = vpop.f32.mrb[32].mxu1  ;;  %v2313_v17 = vpop.f32.mrb[33].mxu0 }
 0x13c   : > { %v2117_v18 = vpack.c.bf16 %v860_v16, %v860_v16  ;;  %v2381_v19 = vpop.f32.mrb[33].mxu1  ;;  %v531_v20 = vpop.f32.mrb[34].mxu0 }
 0x13d   : > { %688 = vst.msk [vmem:[%s2968_s25 + $0x40] sm:$0xf] %vm671_vm1, %v2091_v15  ;;  %v2092_v21 = vpack.c.bf16 %v531_v20, %v531_v20  ;;  %v863_v22 = vpop.f32.mrb[34].mxu1  ;;  %v2314_v23 = vpop.f32.mrb[35].mxu0 }
 0x13e   : > { %1019 = vst.msk [vmem:[%s2973_s28 + $0x40] sm:$0xf] %vm671_vm1, %v2117_v18  ;;  %v2118_v24 = vpack.c.bf16 %v863_v22, %v863_v22  ;;  %v2382_v25 = vpop.f32.mrb[35].mxu1 }
 0x13f   : > { %689 = vst.msk [vmem:[%s2968_s25 + $0x44] sm:$0xf] %vm671_vm1, %v2092_v21 }
 0x140   : > { %1020 = vst.msk [vmem:[%s2973_s28 + $0x44] sm:$0xf] %vm671_vm1, %v2118_v24 }
 0x142   : > { %v536_v26 = vpop.f32.mrb[36].mxu0 }
 0x143   : > { %v2093_v27 = vpack.c.bf16 %v536_v26, %v536_v26  ;;  %v868_v28 = vpop.f32.mrb[36].mxu1  ;;  %v2317_v29 = vpop.f32.mrb[37].mxu0 }
 0x144   : > { %v2119_v30 = vpack.c.bf16 %v868_v28, %v868_v28  ;;  %v2385_v31 = vpop.f32.mrb[37].mxu1  ;;  %v539_v32 = vpop.f32.mrb[38].mxu0 }
 0x145   : > { %690 = vst.msk [vmem:[%s2968_s25 + $0x48] sm:$0xf] %vm671_vm1, %v2093_v27  ;;  %v2094_v33 = vpack.c.bf16 %v539_v32, %v539_v32  ;;  %v871_v34 = vpop.f32.mrb[38].mxu1  ;;  %v2318_v35 = vpop.f32.mrb[39].mxu0 }
 0x146   : > { %1021 = vst.msk [vmem:[%s2973_s28 + $0x48] sm:$0xf] %vm671_vm1, %v2119_v30  ;;  %v2120_v36 = vpack.c.bf16 %v871_v34, %v871_v34  ;;  %v2386_v37 = vpop.f32.mrb[39].mxu1 }
 0x147   : > { %691 = vst.msk [vmem:[%s2968_s25 + $0x4c] sm:$0xf] %vm671_vm1, %v2094_v33 }
 0x148   : > { %1022 = vst.msk [vmem:[%s2973_s28 + $0x4c] sm:$0xf] %vm671_vm1, %v2120_v36 }
 0x14a   : > { %v544_v38 = vpop.f32.mrb[40].mxu0 }
 0x14b   : > { %v2095_v39 = vpack.c.bf16 %v544_v38, %v544_v38  ;;  %v876_v40 = vpop.f32.mrb[40].mxu1  ;;  %v2321_v41 = vpop.f32.mrb[41].mxu0 }
 0x14c   : > { %v2121_v42 = vpack.c.bf16 %v876_v40, %v876_v40  ;;  %v2389_v43 = vpop.f32.mrb[41].mxu1  ;;  %v547_v44 = vpop.f32.mrb[42].mxu0 }
 0x14d   : > { %692 = vst.msk [vmem:[%s2968_s25 + $0x50] sm:$0xf] %vm671_vm1, %v2095_v39  ;;  %v2096_v45 = vpack.c.bf16 %v547_v44, %v547_v44  ;;  %v879_v46 = vpop.f32.mrb[42].mxu1  ;;  %v2322_v47 = vpop.f32.mrb[43].mxu0 }
 0x14e   : > { %1023 = vst.msk [vmem:[%s2973_s28 + $0x50] sm:$0xf] %vm671_vm1, %v2121_v42  ;;  %v2122_v48 = vpack.c.bf16 %v879_v46, %v879_v46  ;;  %v2390_v49 = vpop.f32.mrb[43].mxu1 }
 0x14f   : > { %693 = vst.msk [vmem:[%s2968_s25 + $0x54] sm:$0xf] %vm671_vm1, %v2096_v45 }
 0x150   : > { %1024 = vst.msk [vmem:[%s2973_s28 + $0x54] sm:$0xf] %vm671_vm1, %v2122_v48 }
 0x152   : > { %v552_v50 = vpop.f32.mrb[44].mxu0 }
 0x153   : > { %v2097_v51 = vpack.c.bf16 %v552_v50, %v552_v50  ;;  %v884_v52 = vpop.f32.mrb[44].mxu1  ;;  %v2325_v53 = vpop.f32.mrb[45].mxu0 }
 0x154   : > { %v2123_v54 = vpack.c.bf16 %v884_v52, %v884_v52  ;;  %v2393_v55 = vpop.f32.mrb[45].mxu1  ;;  %v555_v56 = vpop.f32.mrb[46].mxu0 }
 0x155   : > { %694 = vst.msk [vmem:[%s2968_s25 + $0x58] sm:$0xf] %vm671_vm1, %v2097_v51  ;;  %v2098_v57 = vpack.c.bf16 %v555_v56, %v555_v56  ;;  %v887_v58 = vpop.f32.mrb[46].mxu1  ;;  %v2326_v59 = vpop.f32.mrb[47].mxu0 }
 0x156   : > { %1025 = vst.msk [vmem:[%s2973_s28 + $0x58] sm:$0xf] %vm671_vm1, %v2123_v54  ;;  %v2124_v60 = vpack.c.bf16 %v887_v58, %v887_v58  ;;  %v2394_v61 = vpop.f32.mrb[47].mxu1 }
 0x157   : > { %695 = vst.msk [vmem:[%s2968_s25 + $0x5c] sm:$0xf] %vm671_vm1, %v2098_v57 }
 0x158   : > { %1026 = vst.msk [vmem:[%s2973_s28 + $0x5c] sm:$0xf] %vm671_vm1, %v2124_v60 }
 0x15a   : > { %v560_v62 = vpop.f32.mrb[48].mxu0 }
 0x15b   : > { %v2099_v63 = vpack.c.bf16 %v560_v62, %v560_v62  ;;  %v892_v0 = vpop.f32.mrb[48].mxu1  ;;  %v2329_v1 = vpop.f32.mrb[49].mxu0 }
 0x15c   : > { %v2125_v2 = vpack.c.bf16 %v892_v0, %v892_v0  ;;  %v2397_v3 = vpop.f32.mrb[49].mxu1  ;;  %v563_v4 = vpop.f32.mrb[50].mxu0 }
 0x15d   : > { %696 = vst.msk [vmem:[%s2968_s25 + $0x60] sm:$0xf] %vm671_vm1, %v2099_v63  ;;  %v2100_v5 = vpack.c.bf16 %v563_v4, %v563_v4  ;;  %v895_v6 = vpop.f32.mrb[50].mxu1  ;;  %v2330_v7 = vpop.f32.mrb[51].mxu0 }
 0x15e   : > { %1027 = vst.msk [vmem:[%s2973_s28 + $0x60] sm:$0xf] %vm671_vm1, %v2125_v2  ;;  %v2126_v8 = vpack.c.bf16 %v895_v6, %v895_v6  ;;  %v2398_v9 = vpop.f32.mrb[51].mxu1 }
 0x15f   : > { %697 = vst.msk [vmem:[%s2968_s25 + $0x64] sm:$0xf] %vm671_vm1, %v2100_v5 }
 0x160   : > { %1028 = vst.msk [vmem:[%s2973_s28 + $0x64] sm:$0xf] %vm671_vm1, %v2126_v8 }
 0x162   : > { %v1128_v10 = vpop.f32.mrb[52].mxu0 }
 0x163   : > { %v2127_v11 = vpack.c.bf16 %v1128_v10, %v1128_v10  ;;  %v1461_v12 = vpop.f32.mrb[52].mxu1  ;;  %v2417_v13 = vpop.f32.mrb[53].mxu0 }
 0x164   : > { %v2153_v14 = vpack.c.bf16 %v1461_v12, %v1461_v12  ;;  %v2485_v15 = vpop.f32.mrb[53].mxu1  ;;  %v1131_v16 = vpop.f32.mrb[54].mxu0 }
 0x165   : > { %1971 = vst.msk [vmem:[%s2968_s25 + $0x68] sm:$0xf] %vm671_vm1, %v2127_v11  ;;  %v2128_v17 = vpack.c.bf16 %v1131_v16, %v1131_v16  ;;  %v1464_v18 = vpop.f32.mrb[54].mxu1  ;;  %v2418_v19 = vpop.f32.mrb[55].mxu0 }
 0x166   : > { %2047 = vst.msk [vmem:[%s2973_s28 + $0x68] sm:$0xf] %vm671_vm1, %v2153_v14  ;;  %v2154_v20 = vpack.c.bf16 %v1464_v18, %v1464_v18  ;;  %v2486_v21 = vpop.f32.mrb[55].mxu1 }
 0x167   : > { %1972 = vst.msk [vmem:[%s2968_s25 + $0x6c] sm:$0xf] %vm671_vm1, %v2128_v17 }
 0x168   : > { %2048 = vst.msk [vmem:[%s2973_s28 + $0x6c] sm:$0xf] %vm671_vm1, %v2154_v20 }
 0x16a   : > { %v1136_v22 = vpop.f32.mrb[56].mxu0 }
 0x16b   : > { %v2129_v23 = vpack.c.bf16 %v1136_v22, %v1136_v22  ;;  %v1469_v24 = vpop.f32.mrb[56].mxu1  ;;  %v2421_v25 = vpop.f32.mrb[57].mxu0 }
 0x16c   : > { %v2155_v26 = vpack.c.bf16 %v1469_v24, %v1469_v24  ;;  %v2489_v27 = vpop.f32.mrb[57].mxu1  ;;  %v1139_v28 = vpop.f32.mrb[58].mxu0 }
 0x16d   : > { %1973 = vst.msk [vmem:[%s2968_s25 + $0x70] sm:$0xf] %vm671_vm1, %v2129_v23  ;;  %v2130_v29 = vpack.c.bf16 %v1139_v28, %v1139_v28  ;;  %v1472_v30 = vpop.f32.mrb[58].mxu1  ;;  %v2422_v31 = vpop.f32.mrb[59].mxu0 }
 0x16e   : > { %2049 = vst.msk [vmem:[%s2973_s28 + $0x70] sm:$0xf] %vm671_vm1, %v2155_v26  ;;  %v2156_v32 = vpack.c.bf16 %v1472_v30, %v1472_v30  ;;  %v2490_v33 = vpop.f32.mrb[59].mxu1 }
 0x16f   : > { %1974 = vst.msk [vmem:[%s2968_s25 + $0x74] sm:$0xf] %vm671_vm1, %v2130_v29 }
 0x170   : > { %2050 = vst.msk [vmem:[%s2973_s28 + $0x74] sm:$0xf] %vm671_vm1, %v2156_v32 }
 0x172   : > { %v1144_v34 = vpop.f32.mrb[60].mxu0 }
 0x173   : > { %v2131_v35 = vpack.c.bf16 %v1144_v34, %v1144_v34  ;;  %v1477_v36 = vpop.f32.mrb[60].mxu1  ;;  %v2425_v37 = vpop.f32.mrb[61].mxu0 }
 0x174   : > { %v2157_v38 = vpack.c.bf16 %v1477_v36, %v1477_v36  ;;  %v2493_v39 = vpop.f32.mrb[61].mxu1  ;;  %v1147_v40 = vpop.f32.mrb[62].mxu0 }
 0x175   : > { %1975 = vst.msk [vmem:[%s2968_s25 + $0x78] sm:$0xf] %vm671_vm1, %v2131_v35  ;;  %v2132_v41 = vpack.c.bf16 %v1147_v40, %v1147_v40  ;;  %v1480_v42 = vpop.f32.mrb[62].mxu1  ;;  %v2426_v43 = vpop.f32.mrb[63].mxu0 }
 0x176   : > { %2051 = vst.msk [vmem:[%s2973_s28 + $0x78] sm:$0xf] %vm671_vm1, %v2157_v38  ;;  %v2158_v44 = vpack.c.bf16 %v1480_v42, %v1480_v42  ;;  %v2494_v45 = vpop.f32.mrb[63].mxu1 }
 0x177   : > { %1976 = vst.msk [vmem:[%s2968_s25 + $0x7c] sm:$0xf] %vm671_vm1, %v2132_v41 }
 0x178   : > { %2052 = vst.msk [vmem:[%s2973_s28 + $0x7c] sm:$0xf] %vm671_vm1, %v2158_v44 }
 0x17a   : > { %v1152_v46 = vpop.f32.mrb[64].mxu0 }
 0x17b   : > { %v2133_v47 = vpack.c.bf16 %v1152_v46, %v1152_v46  ;;  %v1485_v48 = vpop.f32.mrb[64].mxu1  ;;  %v2429_v49 = vpop.f32.mrb[65].mxu0 }
 0x17c   : > { %v2159_v50 = vpack.c.bf16 %v1485_v48, %v1485_v48  ;;  %v2497_v51 = vpop.f32.mrb[65].mxu1  ;;  %v1155_v52 = vpop.f32.mrb[66].mxu0 }
 0x17d   : > { %1977 = vst.msk [vmem:[%s2968_s25 + $0x80] sm:$0xf] %vm671_vm1, %v2133_v47  ;;  %v2134_v53 = vpack.c.bf16 %v1155_v52, %v1155_v52  ;;  %v1488_v54 = vpop.f32.mrb[66].mxu1  ;;  %v2430_v55 = vpop.f32.mrb[67].mxu0 }
 0x17e   : > { %2053 = vst.msk [vmem:[%s2973_s28 + $0x80] sm:$0xf] %vm671_vm1, %v2159_v50  ;;  %v2160_v56 = vpack.c.bf16 %v1488_v54, %v1488_v54  ;;  %v2498_v57 = vpop.f32.mrb[67].mxu1 }
 0x17f   : > { %1978 = vst.msk [vmem:[%s2968_s25 + $0x84] sm:$0xf] %vm671_vm1, %v2134_v53 }
 0x180   : > { %2054 = vst.msk [vmem:[%s2973_s28 + $0x84] sm:$0xf] %vm671_vm1, %v2160_v56 }
 0x182   : > { %v1160_v58 = vpop.f32.mrb[68].mxu0 }
 0x183   : > { %v2135_v59 = vpack.c.bf16 %v1160_v58, %v1160_v58  ;;  %v1493_v60 = vpop.f32.mrb[68].mxu1  ;;  %v2433_v61 = vpop.f32.mrb[69].mxu0 }
 0x184   : > { %v2161_v62 = vpack.c.bf16 %v1493_v60, %v1493_v60  ;;  %v2501_v63 = vpop.f32.mrb[69].mxu1  ;;  %v1163_v0 = vpop.f32.mrb[70].mxu0 }
 0x185   : > { %1979 = vst.msk [vmem:[%s2968_s25 + $0x88] sm:$0xf] %vm671_vm1, %v2135_v59  ;;  %v2136_v1 = vpack.c.bf16 %v1163_v0, %v1163_v0  ;;  %v1496_v2 = vpop.f32.mrb[70].mxu1  ;;  %v2434_v3 = vpop.f32.mrb[71].mxu0 }
 0x186   : > { %2055 = vst.msk [vmem:[%s2973_s28 + $0x88] sm:$0xf] %vm671_vm1, %v2161_v62  ;;  %v2162_v4 = vpack.c.bf16 %v1496_v2, %v1496_v2  ;;  %v2502_v5 = vpop.f32.mrb[71].mxu1 }
 0x187   : > { %1980 = vst.msk [vmem:[%s2968_s25 + $0x8c] sm:$0xf] %vm671_vm1, %v2136_v1 }
 0x188   : > { %2056 = vst.msk [vmem:[%s2973_s28 + $0x8c] sm:$0xf] %vm671_vm1, %v2162_v4 }
 0x18a   : > { %v1168_v6 = vpop.f32.mrb[72].mxu0 }
 0x18b   : > { %v2137_v7 = vpack.c.bf16 %v1168_v6, %v1168_v6  ;;  %v1501_v8 = vpop.f32.mrb[72].mxu1  ;;  %v2437_v9 = vpop.f32.mrb[73].mxu0 }
 0x18c   : > { %v2163_v10 = vpack.c.bf16 %v1501_v8, %v1501_v8  ;;  %v2505_v11 = vpop.f32.mrb[73].mxu1  ;;  %v1171_v12 = vpop.f32.mrb[74].mxu0 }
 0x18d   : > { %1981 = vst.msk [vmem:[%s2968_s25 + $0x90] sm:$0xf] %vm671_vm1, %v2137_v7  ;;  %v2138_v13 = vpack.c.bf16 %v1171_v12, %v1171_v12  ;;  %v1504_v14 = vpop.f32.mrb[74].mxu1  ;;  %v2438_v15 = vpop.f32.mrb[75].mxu0 }
 0x18e   : > { %2057 = vst.msk [vmem:[%s2973_s28 + $0x90] sm:$0xf] %vm671_vm1, %v2163_v10  ;;  %v2164_v16 = vpack.c.bf16 %v1504_v14, %v1504_v14  ;;  %v2506_v17 = vpop.f32.mrb[75].mxu1 }
 0x18f   : > { %1982 = vst.msk [vmem:[%s2968_s25 + $0x94] sm:$0xf] %vm671_vm1, %v2138_v13 }
 0x190   : > { %2058 = vst.msk [vmem:[%s2973_s28 + $0x94] sm:$0xf] %vm671_vm1, %v2164_v16 }
 0x192   : > { %v1176_v18 = vpop.f32.mrb[76].mxu0 }
 0x193   : > { %v2139_v19 = vpack.c.bf16 %v1176_v18, %v1176_v18  ;;  %v1509_v20 = vpop.f32.mrb[76].mxu1  ;;  %v2441_v21 = vpop.f32.mrb[77].mxu0 }
 0x194   : > { %v2165_v22 = vpack.c.bf16 %v1509_v20, %v1509_v20  ;;  %v2509_v23 = vpop.f32.mrb[77].mxu1  ;;  %v1179_v24 = vpop.f32.mrb[78].mxu0 }
 0x195   : > { %1983 = vst.msk [vmem:[%s2968_s25 + $0x98] sm:$0xf] %vm671_vm1, %v2139_v19  ;;  %v2140_v25 = vpack.c.bf16 %v1179_v24, %v1179_v24  ;;  %v1512_v26 = vpop.f32.mrb[78].mxu1  ;;  %v2442_v27 = vpop.f32.mrb[79].mxu0 }
 0x196   : > { %2059 = vst.msk [vmem:[%s2973_s28 + $0x98] sm:$0xf] %vm671_vm1, %v2165_v22  ;;  %v2166_v28 = vpack.c.bf16 %v1512_v26, %v1512_v26  ;;  %v2510_v29 = vpop.f32.mrb[79].mxu1 }
 0x197   : > { %1984 = vst.msk [vmem:[%s2968_s25 + $0x9c] sm:$0xf] %vm671_vm1, %v2140_v25 }
 0x198   : > { %2060 = vst.msk [vmem:[%s2973_s28 + $0x9c] sm:$0xf] %vm671_vm1, %v2166_v28 }
 0x19a   : > { %v1184_v30 = vpop.f32.mrb[80].mxu0 }
 0x19b   : > { %v2141_v31 = vpack.c.bf16 %v1184_v30, %v1184_v30  ;;  %v1517_v32 = vpop.f32.mrb[80].mxu1  ;;  %v2445_v33 = vpop.f32.mrb[81].mxu0 }
 0x19c   : > { %v2167_v34 = vpack.c.bf16 %v1517_v32, %v1517_v32  ;;  %v2513_v35 = vpop.f32.mrb[81].mxu1  ;;  %v1187_v36 = vpop.f32.mrb[82].mxu0 }
 0x19d   : > { %1985 = vst.msk [vmem:[%s2968_s25 + $0xa0] sm:$0xf] %vm671_vm1, %v2141_v31  ;;  %v2142_v37 = vpack.c.bf16 %v1187_v36, %v1187_v36  ;;  %v1520_v38 = vpop.f32.mrb[82].mxu1  ;;  %v2446_v39 = vpop.f32.mrb[83].mxu0 }
 0x19e   : > { %2061 = vst.msk [vmem:[%s2973_s28 + $0xa0] sm:$0xf] %vm671_vm1, %v2167_v34  ;;  %v2168_v40 = vpack.c.bf16 %v1520_v38, %v1520_v38  ;;  %v2514_v41 = vpop.f32.mrb[83].mxu1 }
 0x19f   : > { %1986 = vst.msk [vmem:[%s2968_s25 + $0xa4] sm:$0xf] %vm671_vm1, %v2142_v37 }
 0x1a0   : > { %2062 = vst.msk [vmem:[%s2973_s28 + $0xa4] sm:$0xf] %vm671_vm1, %v2168_v40 }
 0x1a2   : > { %v1192_v42 = vpop.f32.mrb[84].mxu0 }
 0x1a3   : > { %v2143_v43 = vpack.c.bf16 %v1192_v42, %v1192_v42  ;;  %v1525_v44 = vpop.f32.mrb[84].mxu1  ;;  %v2449_v45 = vpop.f32.mrb[85].mxu0 }
 0x1a4   : > { %v2169_v46 = vpack.c.bf16 %v1525_v44, %v1525_v44  ;;  %v2517_v47 = vpop.f32.mrb[85].mxu1  ;;  %v1195_v48 = vpop.f32.mrb[86].mxu0 }
 0x1a5   : > { %1987 = vst.msk [vmem:[%s2968_s25 + $0xa8] sm:$0xf] %vm671_vm1, %v2143_v43  ;;  %v2144_v49 = vpack.c.bf16 %v1195_v48, %v1195_v48  ;;  %v1528_v50 = vpop.f32.mrb[86].mxu1  ;;  %v2450_v51 = vpop.f32.mrb[87].mxu0 }
 0x1a6   : > { %2063 = vst.msk [vmem:[%s2973_s28 + $0xa8] sm:$0xf] %vm671_vm1, %v2169_v46  ;;  %v2170_v52 = vpack.c.bf16 %v1528_v50, %v1528_v50  ;;  %v2518_v53 = vpop.f32.mrb[87].mxu1 }
 0x1a7   : > { %1988 = vst.msk [vmem:[%s2968_s25 + $0xac] sm:$0xf] %vm671_vm1, %v2144_v49 }
 0x1a8   : > { %2064 = vst.msk [vmem:[%s2973_s28 + $0xac] sm:$0xf] %vm671_vm1, %v2170_v52 }
 0x1aa   : > { %v1200_v54 = vpop.f32.mrb[88].mxu0 }
 0x1ab   : > { %v2145_v55 = vpack.c.bf16 %v1200_v54, %v1200_v54  ;;  %v1533_v56 = vpop.f32.mrb[88].mxu1  ;;  %v2453_v57 = vpop.f32.mrb[89].mxu0 }
 0x1ac   : > { %v2171_v58 = vpack.c.bf16 %v1533_v56, %v1533_v56  ;;  %v2521_v59 = vpop.f32.mrb[89].mxu1  ;;  %v1203_v60 = vpop.f32.mrb[90].mxu0 }
 0x1ad   : > { %1989 = vst.msk [vmem:[%s2968_s25 + $0xb0] sm:$0xf] %vm671_vm1, %v2145_v55  ;;  %v2146_v61 = vpack.c.bf16 %v1203_v60, %v1203_v60  ;;  %v1536_v62 = vpop.f32.mrb[90].mxu1  ;;  %v2454_v63 = vpop.f32.mrb[91].mxu0 }
 0x1ae   : > { %2065 = vst.msk [vmem:[%s2973_s28 + $0xb0] sm:$0xf] %vm671_vm1, %v2171_v58  ;;  %v2172_v0 = vpack.c.bf16 %v1536_v62, %v1536_v62  ;;  %v2522_v1 = vpop.f32.mrb[91].mxu1 }
 0x1af   : > { %1990 = vst.msk [vmem:[%s2968_s25 + $0xb4] sm:$0xf] %vm671_vm1, %v2146_v61 }
 0x1b0   : > { %2066 = vst.msk [vmem:[%s2973_s28 + $0xb4] sm:$0xf] %vm671_vm1, %v2172_v0 }
 0x1b2   : > { %v1208_v2 = vpop.f32.mrb[92].mxu0 }
 0x1b3   : > { %v2147_v3 = vpack.c.bf16 %v1208_v2, %v1208_v2  ;;  %v1541_v4 = vpop.f32.mrb[92].mxu1  ;;  %v2457_v5 = vpop.f32.mrb[93].mxu0 }
 0x1b4   : > { %v2173_v6 = vpack.c.bf16 %v1541_v4, %v1541_v4  ;;  %v2525_v7 = vpop.f32.mrb[93].mxu1  ;;  %v1211_v8 = vpop.f32.mrb[94].mxu0 }
 0x1b5   : > { %1991 = vst.msk [vmem:[%s2968_s25 + $0xb8] sm:$0xf] %vm671_vm1, %v2147_v3  ;;  %v2148_v9 = vpack.c.bf16 %v1211_v8, %v1211_v8  ;;  %v1544_v10 = vpop.f32.mrb[94].mxu1  ;;  %v2458_v11 = vpop.f32.mrb[95].mxu0 }
 0x1b6   : > { %2067 = vst.msk [vmem:[%s2973_s28 + $0xb8] sm:$0xf] %vm671_vm1, %v2173_v6  ;;  %v2174_v12 = vpack.c.bf16 %v1544_v10, %v1544_v10  ;;  %v2526_v13 = vpop.f32.mrb[95].mxu1 }
 0x1b7   : > { %1992 = vst.msk [vmem:[%s2968_s25 + $0xbc] sm:$0xf] %vm671_vm1, %v2148_v9 }
 0x1b8   : > { %2068 = vst.msk [vmem:[%s2973_s28 + $0xbc] sm:$0xf] %vm671_vm1, %v2174_v12 }
 0x1ba   : > { %v1216_v14 = vpop.f32.mrb[96].mxu0 }
 0x1bb   : > { %v2149_v15 = vpack.c.bf16 %v1216_v14, %v1216_v14  ;;  %v1549_v16 = vpop.f32.mrb[96].mxu1  ;;  %v2461_v17 = vpop.f32.mrb[97].mxu0 }
 0x1bc   : > { %v2175_v18 = vpack.c.bf16 %v1549_v16, %v1549_v16  ;;  %v2529_v19 = vpop.f32.mrb[97].mxu1  ;;  %v1219_v20 = vpop.f32.mrb[98].mxu0 }
 0x1bd   : > { %1993 = vst.msk [vmem:[%s2968_s25 + $0xc0] sm:$0xf] %vm671_vm1, %v2149_v15  ;;  %v2150_v21 = vpack.c.bf16 %v1219_v20, %v1219_v20  ;;  %v1552_v22 = vpop.f32.mrb[98].mxu1  ;;  %v2462_v23 = vpop.f32.mrb[99].mxu0 }
 0x1be   : > { %2069 = vst.msk [vmem:[%s2973_s28 + $0xc0] sm:$0xf] %vm671_vm1, %v2175_v18  ;;  %v2176_v24 = vpack.c.bf16 %v1552_v22, %v1552_v22  ;;  %v2530_v25 = vpop.f32.mrb[99].mxu1 }
 0x1bf   : > { %1994 = vst.msk [vmem:[%s2968_s25 + $0xc4] sm:$0xf] %vm671_vm1, %v2150_v21 }
 0x1c0   : > { %2070 = vst.msk [vmem:[%s2973_s28 + $0xc4] sm:$0xf] %vm671_vm1, %v2176_v24 }
 0x1c2   : > { %v1224_v26 = vpop.f32.mrb[100].mxu0 }
 0x1c3   : > { %v2151_v27 = vpack.c.bf16 %v1224_v26, %v1224_v26  ;;  %v1557_v28 = vpop.f32.mrb[100].mxu1  ;;  %v2465_v29 = vpop.f32.mrb[101].mxu0 }
 0x1c4   : > { %v2177_v30 = vpack.c.bf16 %v1557_v28, %v1557_v28  ;;  %v2533_v31 = vpop.f32.mrb[101].mxu1  ;;  %v1227_v32 = vpop.f32.mrb[102].mxu0 }
 0x1c5   : > { %1995 = vst.msk [vmem:[%s2968_s25 + $0xc8] sm:$0xf] %vm671_vm1, %v2151_v27  ;;  %v2152_v33 = vpack.c.bf16 %v1227_v32, %v1227_v32  ;;  %v1560_v34 = vpop.f32.mrb[102].mxu1  ;;  %v2466_v35 = vpop.f32.mrb[103].mxu0 }
 0x1c6   : > { %2071 = vst.msk [vmem:[%s2973_s28 + $0xc8] sm:$0xf] %vm671_vm1, %v2177_v30  ;;  %v2178_v36 = vpack.c.bf16 %v1560_v34, %v1560_v34  ;;  %v2534_v37 = vpop.f32.mrb[103].mxu1 }
 0x1c7   : > { %1996 = vst.msk [vmem:[%s2968_s25 + $0xcc] sm:$0xf] %vm671_vm1, %v2152_v33 }
 0x1c8   : > { %2072 = vst.msk [vmem:[%s2973_s28 + $0xcc] sm:$0xf] %vm671_vm1, %v2178_v36 }
 0x1c9 PF: > { %s15_s17 = sadd.s32 1, %s2630_s17   ;;  %s3197_s15 = smov %s2626_s16 }
 0x1ca   : > { %p12_p5 = scmp.ge.s32.totalorder %s15_s17, 4   ;;  %s3198_s16 = smov %s3200_s18 }
 0x1cc   :  { %14 = sbr.rel (!%p12_p5) target bundleno = 2 (0x2), region = 78 }

</bundles_post_ra>
